<compile_context>
chip_gen: v6e
topology: v6e:2x2x1
jax: 0.10.0
libtpu: 0.0.40
codegen_flags: <defaults>
</compile_context>

<pallas_src>
import functools
import math

import jax
import jax.numpy as jnp
from jax.experimental import pallas as pl
from jax.experimental.pallas import tpu as pltpu


def _round_up(x: int, m: int) -> int:
    return ((x + m - 1) // m) * m


def _global_pool_single_kernel(x_ref, o_ref, *, inv_count):
    # Whole reduce axis resident in one block: sum + scale + cast.
    x = x_ref[...].astype(jnp.float32)
    o_ref[...] = (jnp.sum(x, axis=-1, keepdims=True) * inv_count).astype(o_ref.dtype)


def _global_pool_multi_kernel(x_ref, o_ref, acc_ref, *, inv_count, k_valid, kt,
                              lane_groups, need_mask, num_k):
    # grid = (row_blocks, k_blocks); reduction (K) axis last, "arbitrary".
    k = pl.program_id(1)
    last = num_k - 1

    @pl.when(k == 0)
    def _():
        acc_ref[...] = jnp.zeros_like(acc_ref)

    def accum(n_full_groups, rem_cols):
        # Sum 128-lane chunks elementwise (pure VPU adds; no per-step XLU
        # cross-lane reduce).  `rem_cols > 0` only on the ragged tail tile:
        # that chunk is masked, and fully out-of-range chunks are never loaded.
        parts = []
        for g in range(n_full_groups):
            parts.append(x_ref[:, g * 128:(g + 1) * 128].astype(jnp.float32))
        if rem_cols:
            g = n_full_groups
            chunk = x_ref[:, g * 128:(g + 1) * 128].astype(jnp.float32)
            lane = jax.lax.broadcasted_iota(jnp.int32, chunk.shape, 1)
            parts.append(jnp.where(lane < rem_cols, chunk, 0.0))
        total = parts[0]
        for p in parts[1:]:
            total = total + p
        acc_ref[...] += total

    if need_mask:
        rem = k_valid - last * kt  # static: valid columns in the tail tile

        @pl.when(k != last)
        def _():
            accum(lane_groups, 0)

        @pl.when(k == last)
        def _():
            accum(rem // 128, rem % 128)
    else:
        accum(lane_groups, 0)

    @pl.when(k == last)
    def _():
        # Single deferred cross-lane (XLU) reduce + mean scale + cast.
        s = jnp.sum(acc_ref[...], axis=-1, keepdims=True)
        o_ref[...] = (s * inv_count).astype(o_ref.dtype)


def global_pool(x, *, keep_dim=False, fast_path_bytes=1 << 20):
    """Mean over the trailing spatial dims of a 4D or 5D tensor."""
    if x.ndim == 4:
        n_spatial = 2
    elif x.ndim == 5:
        n_spatial = 3
    else:
        raise NotImplementedError(
            "Currently 2D and 3D global pooling supported")

    lead_shape = x.shape[:-n_spatial]
    reduce_axes = tuple(range(x.ndim - n_spatial, x.ndim))
    N = math.prod(lead_shape)
    K = math.prod(x.shape[-n_spatial:])
    itemsize = x.dtype.itemsize

    # Small-problem fast path: fixed pallas_call overhead dominates tiny maps.
    if N * K * itemsize <= fast_path_bytes:
        return jnp.mean(x, axis=reduce_axes, keepdims=keep_dim)

    # NOTE: output dtype == input dtype; integer inputs would truncate the
    # mean (PyTorch raises for integer mean), floats match module semantics.
    inv_count = 1.0 / float(K)
    x2 = x.reshape(N, K)  # free for contiguous HBM layout

    # Dtype-aware tiling: sublane packing (8 f32 / 16 bf16 / 32 int8 rows) and
    # ~16 KiB of reduce axis per row so per-step HBM bytes are dtype-invariant.
    sub = max(8, 32 // itemsize)
    kt_cap = max(128, ((16 * 1024) // itemsize) // 128 * 128)
    if K <= kt_cap:
        Kt, num_k = K, 1          # block dim == full dim: no lane pad, no mask
    else:
        Kt = kt_cap
        num_k = -(-K // Kt)

    # ~8 MiB input tile (VMEM footprint) amortizes the ~0.35us/step overhead.
    target_tile_bytes = 8 << 20
    kt_lanes = _round_up(Kt, 128)
    nt_ideal = max(sub, (target_tile_bytes // (kt_lanes * itemsize)) // sub * sub)
    Nt = min(_round_up(N, sub), nt_ideal)
    if N >= 2 * sub:
        # Guarantee >= 2 row blocks so both v7x TensorCores get work.
        Nt = min(Nt, _round_up(-(-N // 2), sub))
    num_n = -(-N // Nt)
    # TODO(synk): when N < 2*sub (single row block) and num_k > 1, split the
    # reduction over the parallel axis (per-chunk partials + tiny second
    # reduce) so v7x's second TensorCore is not idle.

    in_tile_bytes = Nt * kt_lanes * itemsize
    vmem_limit = int(min(56 << 20, max(32 << 20, 3 * in_tile_bytes + (4 << 20))))
    cost = pl.CostEstimate(flops=N * K, transcendentals=0,
                           bytes_accessed=N * K * itemsize + N * itemsize)

    # Output is padded to whole row blocks; OOB input rows only ever feed the
    # padded output rows, which are sliced off below (no input pad needed).
    out_shape = jax.ShapeDtypeStruct((num_n * Nt, 1), x.dtype)

    if num_k == 1:
        out = pl.pallas_call(
            functools.partial(_global_pool_single_kernel, inv_count=inv_count),
            out_shape=out_shape,
            grid=(num_n,),
            in_specs=[pl.BlockSpec((Nt, Kt), lambda i: (i, 0))],
            out_specs=pl.BlockSpec((Nt, 1), lambda i: (i, 0)),
            compiler_params=pltpu.CompilerParams(
                dimension_semantics=("parallel",),
                vmem_limit_bytes=vmem_limit),
            cost_estimate=cost,
        )(x2)
    else:
        kernel = functools.partial(
            _global_pool_multi_kernel, inv_count=inv_count, k_valid=K, kt=Kt,
            lane_groups=Kt // 128, need_mask=(K % Kt) != 0, num_k=num_k)
        out = pl.pallas_call(
            kernel,
            out_shape=out_shape,
            grid=(num_n, num_k),
            in_specs=[pl.BlockSpec((Nt, Kt), lambda i, k: (i, k))],
            out_specs=pl.BlockSpec((Nt, 1), lambda i, k: (i, 0)),
            scratch_shapes=[pltpu.VMEM((Nt, 128), jnp.float32)],
            compiler_params=pltpu.CompilerParams(
                dimension_semantics=("parallel", "arbitrary"),
                vmem_limit_bytes=vmem_limit),
            cost_estimate=cost,
        )(x2)

    pooled = out[:N, 0].reshape(lead_shape)
    if keep_dim:
        pooled = pooled.reshape(lead_shape + (1,) * n_spatial)
    return pooled


if __name__ == "__main__":
    key = jax.random.PRNGKey(0)
    k0, k1, k2, k3 = jax.random.split(key, 4)

    # 1) 4D case (B, C, H, W) = (2, 4, 16, 16): default path (small-problem
    #    fast path) and forced Pallas path (single-K-block kernel).
    x = jax.random.normal(k0, (2, 4, 16, 16), dtype=jnp.float32)
    ref = jnp.mean(x, axis=(-2, -1))
    out_fast = jax.block_until_ready(global_pool(x))
    out_pal = jax.block_until_ready(global_pool(x, fast_path_bytes=0))
    assert out_fast.shape == (2, 4) and out_pal.shape == (2, 4)
    assert jnp.allclose(out_fast, ref, atol=1e-5), "4D fast-path mismatch"
    assert jnp.allclose(out_pal, ref, atol=1e-5), "4D pallas mismatch"

    out_kd = jax.block_until_ready(global_pool(x, keep_dim=True, fast_path_bytes=0))
    ref_kd = jnp.mean(x, axis=(-2, -1), keepdims=True)
    assert out_kd.shape == (2, 4, 1, 1)
    assert jnp.allclose(out_kd, ref_kd, atol=1e-5), "keep_dim mismatch"

    # 2) 5D case (B, C, D, H, W) with ragged row block (N=6 rows, Nt=8).
    x5 = jax.random.normal(k1, (2, 3, 4, 8, 8), dtype=jnp.float32)
    out5 = jax.block_until_ready(global_pool(x5, fast_path_bytes=0))
    ref5 = jnp.mean(x5, axis=(-3, -2, -1))
    assert out5.shape == (2, 3)
    assert jnp.allclose(out5, ref5, atol=1e-5), "5D mismatch"

    # 3) Multi-K-block path with masked ragged tail tile (K=5184 > Kt=4096)
    #    and 2 row blocks (megacore split).
    xm = jax.random.normal(k2, (2, 8, 72, 72), dtype=jnp.float32)
    outm = jax.block_until_ready(global_pool(xm, fast_path_bytes=0))
    refm = jnp.mean(xm, axis=(-2, -1))
    assert outm.shape == (2, 8)
    assert jnp.allclose(outm, refm, atol=1e-5), "multi-K masked mismatch"

    # 4) bf16 input (dtype-aware sublane/Kt sizing), f32 accumulation.
    xb = jax.random.normal(k3, (2, 16, 64, 64), dtype=jnp.bfloat16)
    outb = jax.block_until_ready(global_pool(xb, fast_path_bytes=0))
    refb = jnp.mean(xb.astype(jnp.float32), axis=(-2, -1))
    assert outb.shape == (2, 16) and outb.dtype == jnp.bfloat16
    assert jnp.allclose(outb.astype(jnp.float32), refb, atol=2e-2), "bf16 mismatch"

    print("KERNEL_OK")
</pallas_src>

<mosaic_0001>
module attributes {stable_mosaic.version = 11 : i64} {
  func.func @_global_pool_single_kernel(%arg0: i32, %arg1: memref<8x256xf32, #tpu.memory_space<vmem>>, %arg2: memref<8x1xf32, #tpu.memory_space<vmem>>) attributes {dimension_semantics = [#tpu.dimension_semantics<parallel>], iteration_bounds = array<i64: 1>, scalar_prefetch = 0 : i64, scratch_operands = 0 : i64, tpu.core_type = #tpu.core_type<tc>, window_params = [{transform_indices = @transform_0, window_bounds = array<i64: 8, 256>}, {transform_indices = @transform_1, window_bounds = array<i64: 8, 1>}]} {
    %c0 = arith.constant 0 : index
    %c0_0 = arith.constant 0 : index
    %0 = vector.load %arg1[%c0, %c0_0] : memref<8x256xf32, #tpu.memory_space<vmem>>, vector<8x256xf32>
    %cst = arith.constant dense<0.000000e+00> : vector<8xf32>
    %1 = vector.multi_reduction <add>, %0, %cst [1] : vector<8x256xf32> to vector<8xf32>
    %2 = vector.shape_cast %1 : vector<8xf32> to vector<8x1xf32>
    %cst_1 = arith.constant 3.906250e-03 : f32
    %3 = vector.broadcast %cst_1 : f32 to vector<8x1xf32>
    %4 = arith.mulf %2, %3 : vector<8x1xf32>
    %c0_2 = arith.constant 0 : index
    %c0_3 = arith.constant 0 : index
    %5 = vector.load %arg2[%c0_2, %c0_3] : memref<8x1xf32, #tpu.memory_space<vmem>>, vector<8x1xf32>
    tpu.vector_store %arg2[%c0_2, %c0_3], %4 {strides = array<i32>} : memref<8x1xf32, #tpu.memory_space<vmem>>, vector<8x1xf32>,
    return
  }
  func.func @transform_0(%arg0: i32) -> (i32, i32) {
    %c0_i32 = arith.constant 0 : i32
    %c0_i32_0 = arith.constant 0 : i32
    return %arg0, %c0_i32 : i32, i32
  }
  func.func @transform_1(%arg0: i32) -> (i32, i32) {
    %c0_i32 = arith.constant 0 : i32
    %c0_i32_0 = arith.constant 0 : i32
    return %arg0, %c0_i32 : i32, i32
  }
}

</mosaic_0001>

<bundles_post_ra>
// kernel: tpu_custom_call.1
= control target key start
LH: loop header
LB: loop body
LE: loop exit
PB: predicated region body
PF: predicated region fallthrough
CT: control target
= control target key end

     0   :  { %6 = vsyncpa [#allocation3], 0  ;;  %s56_s6 = smov [#allocation2]   ;;  %s73_s0 = inlined_call_operand.hbm [shape: f32[8,256], index: 0, kind: input, shape index: {}]   ;;  %s74_s1 = inlined_call_operand.vmem [shape: f32[8,1], index: 1, kind: output, shape index: {}]  }
   0x1   :  { %s13_s7 = sshll.u32 %s56_s6, 4  ;;  %s14_s7 = int_to_ptr.vmem [resolvable:$true] %s13_s7 }
   0x2   :  { %s42_s8 = scalar_lea.vmem %s14_s7, 256  ;;  %p47_p1 = scmp.lt.s32.totalorder %s14_s7, %s14_s7 }
   0x3   :  { %p43_p0 = scmp.ne.s32.totalorder %s14_s7, %s42_s8  ;;  %p48_p2 = scmp.lt.s32.totalorder %s42_s8, %s42_s8 }
   0x5   :  { %p49_p3 = por %p48_p2, %p47_p1 }
   0x7   :  { %p50_p4 = pnand %p49_p3, %p43_p0 }
   0x9   :  { %53 = shalt.err (!%p50_p4)
}
   0xa   :  { %16 = dma.hbm_to_vmem [thread:$0]  %s73_s0, 256, %s14_s7, [#allocation3]  }
   0xb   :  { %54 = dma.done.wait [#allocation3], 256  }
   0xc   :  { %55 = vsyncadd [#allocation3], 4294967040  ;;  %v20_v0 = vld [vmem:[#allocation2] sm:$0xff]  ;;  %v21_v1 = vld [vmem:[#allocation2 + $0x8] sm:$0xff]  ;;  %vm26_vm0 = vcmask 7168  }
   0xd   :  { %v22_v2 = vadd.f32 %v21_v1, %v20_v0 }
   0xf   :  { %23 = vadd.xlane.f32.xlu0 %v22_v2 }
  0x98   :  { %v24_v3 = vpop.xlane.xlu0 %23 }
  0x99   :  { %v25_v4 = vmul.f32 0.00390625, %v24_v3 }
  0x9b   :  { %27 = vst.msk [vmem:[%s74_s1] sm:$0xff] %vm26_vm0, %v25_v4 }
  0x9c   :  { %32 = vsyncpa [#allocation3], 1 }

</bundles_post_ra>
